<compile_context>
chip_gen: v5e
topology: v5e:2x2
jax: 0.10.0
libtpu: 0.0.40
codegen_flags: <defaults>
</compile_context>

<pallas_src>
import numpy as np
import jax
import jax.numpy as jnp
from jax.experimental import pallas as pl
from jax.experimental.pallas import tpu as pltpu

GP = 128  # packed lane width: all three gates share one 128-lane vreg block


def _round_up(x, m):
    return ((x + m - 1) // m) * m


# ------------------------- roll-direction probe ------------------------------

def _probe_roll_is_np_roll():
    """One-off 1-vreg kernel: does pltpu.roll move elements toward higher lane
    indices (np.roll convention)?  Used to derive the gate-alignment shifts."""
    def k(x_ref, o_ref):
        o_ref[...] = pltpu.roll(x_ref[...], 1, axis=1)

    x = jnp.tile(jnp.arange(GP, dtype=jnp.float32), (8, 1))
    y = pl.pallas_call(k, out_shape=jax.ShapeDtypeStruct((8, GP), jnp.float32))(x)
    return bool(np.asarray(y)[0, 1] == 0.0)


# ------------------------------ Pallas kernel --------------------------------

def make_gru_kernel(num_layers, T, Bp, H, roll_is_np):
    """Fused wavefront kernel: num_layers packed GRU layers + FC head.

    Ref order: x2, (wih, whh, bias, bhn) * num_layers, wfc, bfc, out, gi
      x2   : (T*Bp, Din)   flattened time-major input (batch padded to Bp)
      wih  : (Din|GP, GP)  input->gates, gates packed [r|z|n] in one lane block
      whh  : (GP, GP)      hidden->gates (rows [2H,3H) real; h lives in n lanes)
      bias : (1, GP)       b_ih (+ b_hh folded in for the r and z gates)
      bhn  : (1, GP)       b_hh of the n gate (must stay inside r * (.))
      wfc  : (GP, O), bfc : (1, O)
      out  : (Bp, O)       the only HBM writeback of the whole kernel
      gi   : (T*Bp, GP)    VMEM scratch: hoisted layer-0 input-path pre-acts
    """
    iters = T + num_layers - 1
    # Gate-alignment lane shifts, corrected for the backend rotate direction.
    r_shift = (2 * H) if roll_is_np else (GP - 2 * H)   # r -> n/h lane block
    z_shift = H if roll_is_np else (GP - H)             # z -> n/h lane block
    # Full unroll only while the unrolled live set stays far below the 64-vreg
    # file (each (Bp, GP) f32 tile is Bp/8 vregs; ~7 live tiles per layer-step).
    live_vregs = 7 * num_layers * max(1, Bp // 8)
    unroll = True if (iters <= 16 and live_vregs <= 32) else 4

    def kernel(*refs):
        x_ref = refs[0]
        layer_refs = refs[1:1 + 4 * num_layers]
        wfc_ref = refs[1 + 4 * num_layers]
        bfc_ref = refs[2 + 4 * num_layers]
        out_ref = refs[3 + 4 * num_layers]
        gi_ref = refs[4 + 4 * num_layers]

        # Layer-0 input-path matmul hoisted out of the recurrence: one
        # well-shaped (T*Bp, Din) x (Din, GP) MXU op instead of T small ones.
        wih0_ref = layer_refs[0]
        bias0_ref = layer_refs[2]
        gi_ref[...] = (
            jnp.dot(x_ref[...], wih0_ref[...], preferred_element_type=jnp.float32)
            + bias0_ref[...]
        )

        # Loop-invariant hoists (broadcasts are not CSE'd inside unrolled loops).
        bhn_b, bias_b = [], []
        for l in range(num_layers):
            bias_ref, bhn_ref = layer_refs[4 * l + 2], layer_refs[4 * l + 3]
            bhn_b.append(jnp.broadcast_to(bhn_ref[...], (Bp, GP)))
            bias_b.append(jnp.broadcast_to(bias_ref[...], (Bp, GP)) if l > 0 else None)

        def gru_step(l, h, gi):
            """One packed GRU step; valid state lives in lanes [2H, 3H)."""
            whh_ref = layer_refs[4 * l + 1]
            gh = jnp.dot(h, whh_ref[...], preferred_element_type=jnp.float32)
            sz = jax.nn.sigmoid(gi + gh)                # r @ [0,H), z @ [H,2H)
            r_n = pltpu.roll(sz, r_shift, axis=1)       # r -> lanes [2H,3H)
            z_n = pltpu.roll(sz, z_shift, axis=1)       # z -> lanes [2H,3H)
            n = jnp.tanh(gi + r_n * (gh + bhn_b[l]))    # n @ [2H,3H)
            return (1.0 - z_n) * n + z_n * h            # h_new @ [2H,3H)

        def body(i, hs):
            new_hs = []
            for l in range(num_layers):
                t = i - l                               # this layer's timestep
                h = hs[l]
                if l == 0:
                    row = pl.multiple_of(jnp.minimum(t, T - 1) * Bp, Bp)
                    gi = gi_ref[pl.ds(row, Bp), :]
                else:
                    # Per-step input matmul from the previous layer's carry
                    # (its output at exactly this layer's timestep).
                    wih_ref = layer_refs[4 * l]
                    gi = (
                        jnp.dot(hs[l - 1], wih_ref[...],
                                preferred_element_type=jnp.float32)
                        + bias_b[l]
                    )
                h_new = gru_step(l, h, gi)
                # Exact blend keeps h frozen outside this layer's active window.
                m = jnp.logical_and(t >= 0, t < T).astype(jnp.float32)
                new_hs.append(m * h_new + (1.0 - m) * h)
            return tuple(new_hs)

        h_init = tuple(jnp.zeros((Bp, GP), jnp.float32) for _ in range(num_layers))
        hs = jax.lax.fori_loop(0, iters, body, h_init, unroll=unroll)

        # FC head on the final hidden state only; single small HBM writeback.
        out_ref[...] = (
            jnp.dot(hs[num_layers - 1], wfc_ref[...],
                    preferred_element_type=jnp.float32)
            + bfc_ref[...]
        )

    return kernel


# --------------------------- Parameter preparation ---------------------------

def prepare_params(params, input_dim, hidden_dim):
    """One-time prep: transpose, pack gates into one 128-lane block, fold biases."""
    H = hidden_dim
    if 3 * H > GP:
        # TODO(synk): fall back to one 128-lane block per gate when 3*H > 128.
        raise NotImplementedError("packed-gate layout needs 3*hidden_dim <= 128")
    noff = 2 * H  # the hidden state is kept in the n-gate lane block [2H, 3H)
    layers = []
    for layer, (w_ih, w_hh, b_ih, b_hh) in enumerate(params["gru_layers"]):
        d_in = input_dim if layer == 0 else hidden_dim
        rows, row0 = (input_dim, 0) if layer == 0 else (GP, noff)
        wih_p = jnp.zeros((rows, GP), jnp.float32)
        whh_p = jnp.zeros((GP, GP), jnp.float32)
        bias_p = jnp.zeros((1, GP), jnp.float32)
        bhn_p = jnp.zeros((1, GP), jnp.float32)
        for g in range(3):  # PyTorch gate order [r, z, n]
            wih_p = wih_p.at[row0:row0 + d_in, g * H:(g + 1) * H].set(
                w_ih[g * H:(g + 1) * H, :].T)
            whh_p = whh_p.at[noff:noff + H, g * H:(g + 1) * H].set(
                w_hh[g * H:(g + 1) * H, :].T)
        # fold b_hh into the precomputed bias for r and z; n keeps b_hh separate
        bias_p = bias_p.at[0, 0:H].set(b_ih[0:H] + b_hh[0:H])
        bias_p = bias_p.at[0, H:2 * H].set(b_ih[H:2 * H] + b_hh[H:2 * H])
        bias_p = bias_p.at[0, 2 * H:3 * H].set(b_ih[2 * H:3 * H])
        bhn_p = bhn_p.at[0, 2 * H:3 * H].set(b_hh[2 * H:3 * H])
        layers.append((wih_p, whh_p, bias_p, bhn_p))
    output_dim = params["w_fc"].shape[0]
    wfc_p = jnp.zeros((GP, output_dim), jnp.float32).at[noff:noff + H, :].set(
        params["w_fc"].T)
    bfc_p = params["b_fc"].reshape(1, -1).astype(jnp.float32)
    return {"layers": layers, "wfc": wfc_p, "bfc": bfc_p}


# --------------------------------- Forward -----------------------------------

def gru_model_forward(x, prepped, hidden_dim, roll_is_np):
    """x: (B, T, input_dim) batch_first (like the PyTorch module) -> (B, output_dim)."""
    B, T, D = x.shape
    Bp = _round_up(B, 8)
    O = prepped["wfc"].shape[1]
    num_layers = len(prepped["layers"])

    # TODO(synk): fold this transpose/pad/reshape into the kernel (masked read /
    # index_map) to skip an extra HBM copy of x for long sequences.
    x_tm = jnp.transpose(x, (1, 0, 2)).astype(jnp.float32)           # (T, B, D)
    if Bp != B:
        x_tm = jnp.pad(x_tm, ((0, 0), (0, Bp - B), (0, 0)))
    x2 = x_tm.reshape(T * Bp, D)                                     # flat time-major

    args = [x2]
    for lw in prepped["layers"]:
        args.extend(lw)
    args.extend([prepped["wfc"], prepped["bfc"]])

    # Explicit VMEM budget: resident inputs + gi scratch + output, x2 headroom
    # for compiler scratch / buffering (scoped defaults are only 16-32 MiB).
    resident = sum(int(np.prod(a.shape)) * 4 for a in args)
    resident += T * Bp * GP * 4 + Bp * _round_up(O, 128) * 4
    vmem_limit = int(min(64 << 20, max(32 << 20, 2 * resident)))

    out = pl.pallas_call(
        make_gru_kernel(num_layers, T, Bp, hidden_dim, roll_is_np),
        out_shape=jax.ShapeDtypeStruct((Bp, O), jnp.float32),
        in_specs=[pl.BlockSpec(memory_space=pltpu.MemorySpace.VMEM)] * len(args),
        out_specs=pl.BlockSpec(memory_space=pltpu.MemorySpace.VMEM),
        scratch_shapes=[
            pltpu.VMEM((T * Bp, GP), jnp.float32),  # hoisted layer-0 gate pre-acts
        ],
        compiler_params=pltpu.CompilerParams(vmem_limit_bytes=vmem_limit),
    )(*args)
    return out[:B]


# ----------------------------- Pure-JAX reference ----------------------------

def gru_model_reference(x, params):
    x = x.astype(jnp.float32)
    B = x.shape[0]
    h_seq = x
    for (w_ih, w_hh, b_ih, b_hh) in params["gru_layers"]:
        H = w_hh.shape[1]
        h = jnp.zeros((B, H), jnp.float32)
        outs = []
        for t in range(h_seq.shape[1]):
            x_t = h_seq[:, t, :]
            gi = x_t @ w_ih.T + b_ih
            gh = h @ w_hh.T + b_hh
            i_r, i_z, i_n = gi[:, :H], gi[:, H:2 * H], gi[:, 2 * H:]
            h_r, h_z, h_n = gh[:, :H], gh[:, H:2 * H], gh[:, 2 * H:]
            r = jax.nn.sigmoid(i_r + h_r)
            z = jax.nn.sigmoid(i_z + h_z)
            n = jnp.tanh(i_n + r * h_n)
            h = (1.0 - z) * n + z * h
            outs.append(h)
        h_seq = jnp.stack(outs, axis=1)
    return h_seq[:, -1, :] @ params["w_fc"].T + params["b_fc"]


# ----------------------------------- Main ------------------------------------

def init_params(key, input_dim, hidden_dim, num_layers, output_dim):
    """Deterministic init mimicking PyTorch's U(-1/sqrt(H), 1/sqrt(H))."""
    bound = 1.0 / np.sqrt(hidden_dim)
    params = {"gru_layers": []}
    for layer in range(num_layers):
        d_in = input_dim if layer == 0 else hidden_dim
        key, k1, k2, k3, k4 = jax.random.split(key, 5)
        w_ih = jax.random.uniform(k1, (3 * hidden_dim, d_in), jnp.float32, -bound, bound)
        w_hh = jax.random.uniform(k2, (3 * hidden_dim, hidden_dim), jnp.float32, -bound, bound)
        b_ih = jax.random.uniform(k3, (3 * hidden_dim,), jnp.float32, -bound, bound)
        b_hh = jax.random.uniform(k4, (3 * hidden_dim,), jnp.float32, -bound, bound)
        params["gru_layers"].append((w_ih, w_hh, b_ih, b_hh))
    key, k5, k6 = jax.random.split(key, 3)
    fc_bound = 1.0 / np.sqrt(hidden_dim)
    params["w_fc"] = jax.random.uniform(k5, (output_dim, hidden_dim), jnp.float32, -fc_bound, fc_bound)
    params["b_fc"] = jax.random.uniform(k6, (output_dim,), jnp.float32, -fc_bound, fc_bound)
    return params


if __name__ == "__main__":
    batch, seq_len = 2, 8
    input_dim, hidden_dim, num_layers, output_dim = 4, 32, 2, 3

    key = jax.random.PRNGKey(0)
    key, kx = jax.random.split(key)
    x = jax.random.normal(kx, (batch, seq_len, input_dim), jnp.float32)

    params = init_params(key, input_dim, hidden_dim, num_layers, output_dim)
    prepped = prepare_params(params, input_dim, hidden_dim)   # one-time prep
    roll_is_np = _probe_roll_is_np_roll()                     # one-time probe

    fwd = jax.jit(gru_model_forward, static_argnums=(2, 3))
    out = jax.block_until_ready(fwd(x, prepped, hidden_dim, roll_is_np))

    ref = jax.block_until_ready(gru_model_reference(x, params))
    assert out.shape == (batch, output_dim)
    np.testing.assert_allclose(np.asarray(out), np.asarray(ref), atol=2e-5, rtol=2e-5)

    print("KERNEL_OK")
</pallas_src>

<mosaic_0001>
module attributes {stable_mosaic.version = 11 : i64} {
  func.func @k(%arg0: memref<8x128xf32, #tpu.memory_space<vmem>>, %arg1: memref<8x128xf32, #tpu.memory_space<vmem>>) attributes {dimension_semantics = [], scalar_prefetch = 0 : i64, scratch_operands = 0 : i64, tpu.core_type = #tpu.core_type<tc>} {
    %c0 = arith.constant 0 : index
    %c0_0 = arith.constant 0 : index
    %0 = vector.load %arg0[%c0, %c0_0] : memref<8x128xf32, #tpu.memory_space<vmem>>, vector<8x128xf32>
    %c1_i32 = arith.constant 1 : i32
    %1 = tpu.dynamic_rotate %0 by %c1_i32 dim 1 : vector<8x128xf32>, i32 -> vector<8x128xf32>
    %c0_1 = arith.constant 0 : index
    %c0_2 = arith.constant 0 : index
    %2 = vector.load %arg1[%c0_1, %c0_2] : memref<8x128xf32, #tpu.memory_space<vmem>>, vector<8x128xf32>
    tpu.vector_store %arg1[%c0_1, %c0_2], %1 {strides = array<i32>} : memref<8x128xf32, #tpu.memory_space<vmem>>, vector<8x128xf32>,
    return
  }
}

</mosaic_0001>

<bundles_post_ra>
// kernel: tpu_custom_call.1
= control target key start
LH: loop header
LB: loop body
LE: loop exit
PB: predicated region body
PF: predicated region fallthrough
CT: control target
= control target key end

     0   :  { %6 = vsyncpa [#allocation3], 0  ;;  %s118_s0 = inlined_call_operand.hbm [shape: f32[8,128], index: 0, kind: input, shape index: {}]   ;;  %s119_s1 = inlined_call_operand.hbm [shape: f32[8,128], index: 1, kind: output, shape index: {}]  }
   0x1   :  { %7 = vsyncpa [#allocation4], 0  ;;  %s13_s8 = sshll.u32 %s118_s0, 4  ;;  %s99_s9 = smov [#allocation2]   ;;  %s14_s8 = int_to_ptr.hbm [resolvable:$true] %s13_s8 }
   0x2   :  { %s15_s10 = sshll.u32 %s99_s9, 4  ;;  %s16_s10 = int_to_ptr.vmem [resolvable:$true] %s15_s10 }
   0x3   :  { %18 = dma.hbm_to_vmem [thread:$0]  %s14_s8, 128, %s16_s10, [#allocation3]  }
   0x4   :  { %95 = dma.done.wait [#allocation3], 128  }
   0x5   :  { %96 = vsyncadd [#allocation3], 4294967168  ;;  %v23_v0 = vld [vmem:[#allocation2] sm:$0xff]  ;;  %s100_s11 = smov 1   ;;  %s101_s12 = smov [#allocation5]  }
   0x6   :  { %24 = vrot.lane.b32.xlu0 %v23_v0, %s100_s11  ;;  %s32_s13 = sshll.u32 %s101_s12, 4  ;;  %s34_s16 = sshll.u32 %s119_s1, 4  ;;  %s33_s13 = int_to_ptr.vmem [resolvable:$true] %s32_s13  ;;  %s35_s16 = int_to_ptr.hbm [resolvable:$true] %s34_s16 }
  0x78   :  { %v25_v1 = vpop.permute.xlu0 %24 }
  0x79   :  { %26 = vst [vmem:[#allocation5] sm:$0xff] %v25_v1 }
  0x7a   :  { %37 = dma.vmem_to_hbm [thread:$0]  %s33_s13, 128, %s35_s16, [#allocation4]  }
  0x7b   :  { %97 = dma.done.wait [#allocation4], 128  }
  0x7c   :  { %98 = vsyncadd [#allocation4], 4294967168 }
  0x7d   :  { %42 = vsyncpa [#allocation3], 1 }
  0x7e   :  { %43 = vsyncpa [#allocation4], 1 }

</bundles_post_ra>
